<compile_context>
chip_gen: v6e
topology: v6e:2x2x1
jax: 0.10.0
libtpu: 0.0.40
codegen_flags: <defaults>
</compile_context>

<pallas_src>
import jax
import jax.numpy as jnp
from jax import lax
from jax.experimental import pallas as pl
from jax.experimental.pallas import tpu as pltpu

EPS = 1e-8


def _channel_mlp_mod_kernel(w_ref, x_ref, o_ref):
    # w_ref: (C, C)     pre-modulated+demodulated weight for this sample
    # x_ref: (C, T_HW)  lane-dense pixel tile
    # o_ref: (C, T_HW)
    # Pure streaming channel matmul on the MXU; accumulate in f32, cast at store.
    o_ref[...] = jnp.dot(w_ref[...], x_ref[...],
                         preferred_element_type=jnp.float32).astype(o_ref.dtype)


def _pick_hw_tile(hw, channels, itemsize, n_samples, vmem_cap_bytes,
                  target_tile_bytes):
    """Pick a lane-dense pixel-tile width.

    Constraints: multiple of 128; divides the 128-rounded HW (exact grid, no
    per-tile pad copy); sized by bytes (~target_tile_bytes of x per tile); fits
    the VMEM cap with x+out double-buffered; leaves >=2 grid steps when the
    batch alone cannot feed both v7x TensorCores."""
    hw_rounded = -(-hw // 128) * 128          # <=127 padded columns, often 0
    n128 = hw_rounded // 128
    bytes_per_128 = channels * 128 * itemsize
    max_units = max(1, target_tile_bytes // bytes_per_128)
    # VMEM: 2 arrays (x, out) * 2 pipeline buffers * tile + headroom.
    max_units = min(max_units,
                    max(1, (vmem_cap_bytes - (4 << 20)) // (4 * bytes_per_128)))
    max_units = int(min(max_units, n128))
    if n_samples < 2 and n128 >= 2:           # keep both v7x TCs busy
        max_units = min(max_units, n128 // 2)
    d = max(1, max_units)
    while n128 % d:                           # largest divisor of n128 <= max_units
        d -= 1
    return d * 128, hw_rounded


def channel_mlp_mod(x, style, affine_w, affine_b, conv_w, *, io_dtype=None,
                    hw_tile_bytes=4 << 20):
    """ChannelMLPMod forward.

    x: (N, C, H, W); style: (N, S); affine_w: (C, S); affine_b: (C,);
    conv_w: (C, C)  (the (o, i) slice of the PyTorch (C, C, 1, 1) weight).
    io_dtype: dtype used to stream x / out / wdem through the kernel.  Defaults
      to x.dtype; pass jnp.bfloat16 to halve HBM traffic (demodulation math and
      the MXU accumulation stay in f32 either way).
    """
    N, C, H, W = x.shape
    HW = H * W
    if io_dtype is None:
        io_dtype = x.dtype
    io_dtype = jnp.dtype(io_dtype)
    io_itemsize = io_dtype.itemsize

    # ---- modulation + demodulation hoisted to XLA (all f32), tiny vs N*C*HW ----
    smod = (style.astype(jnp.float32) @ affine_w.astype(jnp.float32).T
            + affine_b.astype(jnp.float32) + 1.0)                       # (N, C)
    wmod = conv_w.astype(jnp.float32)[None, :, :] * smod[:, :, None]    # (N, Co, Ci)
    dmod = lax.rsqrt(jnp.sum(wmod * wmod, axis=2, keepdims=True) + EPS)
    wdem = (wmod * dmod).astype(io_dtype)                               # (N, C, C)

    # ---- generation-aware VMEM cap (v7x: 64 MiB/TC; v5e/v6e: 128 MiB) ---------
    try:
        vmem_capacity = pltpu.get_tpu_info().vmem_capacity_bytes
    except Exception:  # fall back to the smallest (v7x per-TC) size
        vmem_capacity = 64 << 20
    vmem_cap = max(16 << 20, int(vmem_capacity) - (12 << 20))

    t_hw, hw_rounded = _pick_hw_tile(HW, C, io_itemsize, N, vmem_cap,
                                     hw_tile_bytes)
    num_tiles = hw_rounded // t_hw

    x_flat = x.reshape(N, C, HW).astype(io_dtype)
    if hw_rounded != HW:           # pad only to the next 128 lanes (<=127 cols)
        x_flat = jnp.pad(x_flat, ((0, 0), (0, 0), (0, hw_rounded - HW)))

    tile_bytes = C * t_hw * io_itemsize
    vmem_need = 4 * tile_bytes + 2 * C * C * io_itemsize + (2 << 20)
    vmem_limit = int(min(max(vmem_need, 16 << 20), vmem_cap))

    cost = pl.CostEstimate(
        flops=int(2 * N * C * C * HW),
        transcendentals=0,
        bytes_accessed=int(2 * N * C * hw_rounded * io_itemsize
                           + N * C * C * io_itemsize))

    out_flat = pl.pallas_call(
        _channel_mlp_mod_kernel,
        out_shape=jax.ShapeDtypeStruct((N, C, hw_rounded), io_dtype),
        grid_spec=pltpu.PrefetchScalarGridSpec(
            num_scalar_prefetch=0,
            grid=(N, num_tiles),
            in_specs=[
                # wdem: constant block index across the HW-tile axis -> only
                # re-DMA'd when the sample changes.
                pl.BlockSpec((None, C, C), lambda n, t: (n, 0, 0)),
                # x: lane-dense (C, T_HW) tile, sample dim squeezed out.
                pl.BlockSpec((None, C, t_hw), lambda n, t: (n, 0, t)),
            ],
            out_specs=pl.BlockSpec((None, C, t_hw), lambda n, t: (n, 0, t)),
        ),
        compiler_params=pltpu.CompilerParams(
            dimension_semantics=("parallel", "parallel"),
            vmem_limit_bytes=vmem_limit),
        cost_estimate=cost,
    )(wdem, x_flat)

    if hw_rounded != HW:
        out_flat = out_flat[:, :, :HW]
    return out_flat.reshape(N, C, H, W)


def _reference(x, style, affine_w, affine_b, conv_w, io_dtype=jnp.float32):
    """Pure-JAX reference mirroring the PyTorch forward.  io_dtype quantizes the
    streamed operands (x, wdem) the same way the kernel's I/O path does, so the
    bf16 smoke test can be checked tightly; f32 leaves it untouched."""
    y = style @ affine_w.T + affine_b                       # (N, C)
    s = y + 1.0
    wmod = conv_w[None, :, :] * s[:, :, None]               # (N, C_out, C_in)
    d = lax.rsqrt(jnp.sum(wmod * wmod, axis=2, keepdims=True) + EPS)
    wdem = (wmod * d).astype(io_dtype).astype(jnp.float32)
    xq = x.astype(io_dtype).astype(jnp.float32)
    return jnp.einsum("noi,nihw->nohw", wdem, xq)


if __name__ == "__main__":
    # Small shapes consistent with the module: batch=2, channels=4, spatial=16,
    # style_dim=8.
    N, C, H, W, S = 2, 4, 16, 16, 8

    key = jax.random.PRNGKey(0)
    k_x, k_s, k_cw, k_aw, k_ab = jax.random.split(key, 5)

    x = jax.random.normal(k_x, (N, C, H, W), dtype=jnp.float32)
    style = jax.random.normal(k_s, (N, S), dtype=jnp.float32)

    # Conv2dMod weight: kaiming_normal_(fan_in, leaky_relu a=0) on (C, C, 1, 1)
    fan_in = C * 1 * 1
    conv_w = jax.random.normal(k_cw, (C, C), dtype=jnp.float32) * jnp.sqrt(2.0 / fan_in)

    # nn.Linear(style_dim, channels) default init: U(-1/sqrt(S), 1/sqrt(S))
    bound = 1.0 / jnp.sqrt(S)
    affine_w = jax.random.uniform(k_aw, (C, S), minval=-bound, maxval=bound,
                                  dtype=jnp.float32)
    affine_b = jax.random.uniform(k_ab, (C,), minval=-bound, maxval=bound,
                                  dtype=jnp.float32)

    # 1) f32 I/O path — matches the f32 PyTorch module at 1e-4.
    out = jax.block_until_ready(channel_mlp_mod(x, style, affine_w, affine_b, conv_w))
    ref = _reference(x, style, affine_w, affine_b, conv_w)
    assert out.shape == (N, C, H, W)
    assert jnp.allclose(out, ref, atol=1e-4, rtol=1e-4), "mismatch vs reference (f32)"

    # 2) Non-128-aligned HW (HW=100 -> padded to 128, <=127 cols, sliced off).
    H2, W2 = 10, 10
    x2 = jax.random.normal(k_x, (N, C, H2, W2), dtype=jnp.float32)
    out2 = jax.block_until_ready(channel_mlp_mod(x2, style, affine_w, affine_b, conv_w))
    ref2 = _reference(x2, style, affine_w, affine_b, conv_w)
    assert out2.shape == (N, C, H2, W2)
    assert jnp.allclose(out2, ref2, atol=1e-4, rtol=1e-4), "mismatch vs reference (padded HW)"

    # 3) bf16 streaming path (halved HBM traffic; demod + MXU accumulate stay f32).
    out_bf = jax.block_until_ready(
        channel_mlp_mod(x, style, affine_w, affine_b, conv_w, io_dtype=jnp.bfloat16))
    ref_bf = _reference(x, style, affine_w, affine_b, conv_w, io_dtype=jnp.bfloat16)
    assert out_bf.shape == (N, C, H, W)
    assert out_bf.dtype == jnp.bfloat16
    assert jnp.allclose(out_bf.astype(jnp.float32), ref_bf, atol=2e-2, rtol=2e-2), \
        "mismatch vs reference (bf16 I/O)"

    print("KERNEL_OK")
</pallas_src>

<mosaic_0001>
module attributes {stable_mosaic.version = 11 : i64} {
  func.func @_channel_mlp_mod_kernel(%arg0: i32, %arg1: i32, %arg2: memref<1x4x4xf32, #tpu.memory_space<vmem>>, %arg3: memref<1x4x256xf32, #tpu.memory_space<vmem>>, %arg4: memref<1x4x256xf32, #tpu.memory_space<vmem>>) attributes {dimension_semantics = [#tpu.dimension_semantics<parallel>, #tpu.dimension_semantics<parallel>], iteration_bounds = array<i64: 2, 1>, scalar_prefetch = 0 : i64, scratch_operands = 0 : i64, tpu.core_type = #tpu.core_type<tc>, window_params = [{transform_indices = @transform_0, window_bounds = array<i64: 1, 4, 4>}, {transform_indices = @transform_1, window_bounds = array<i64: 1, 4, 256>}, {transform_indices = @transform_2, window_bounds = array<i64: 1, 4, 256>}]} {
    %c0 = arith.constant 0 : index
    %c0_0 = arith.constant 0 : index
    %c0_1 = arith.constant 0 : index
    %0 = vector.load %arg2[%c0, %c0_0, %c0_1] : memref<1x4x4xf32, #tpu.memory_space<vmem>>, vector<1x4x4xf32>
    %1 = vector.shape_cast %0 : vector<1x4x4xf32> to vector<4x4xf32>
    %c0_2 = arith.constant 0 : index
    %c0_3 = arith.constant 0 : index
    %c0_4 = arith.constant 0 : index
    %2 = vector.load %arg3[%c0_2, %c0_3, %c0_4] : memref<1x4x256xf32, #tpu.memory_space<vmem>>, vector<1x4x256xf32>
    %3 = vector.shape_cast %2 : vector<1x4x256xf32> to vector<4x256xf32>
    %cst = arith.constant dense<0.000000e+00> : vector<4x256xf32>
    %4 = tpu.matmul %1, %3, %cst {dimension_numbers = #tpu.dot_dimension_numbers<[1], [0], [0], [1], [0, 0, 1, 1], [], []>} : vector<4x4xf32>, vector<4x256xf32>, vector<4x256xf32> -> vector<4x256xf32>
    %c0_5 = arith.constant 0 : index
    %c0_6 = arith.constant 0 : index
    %c0_7 = arith.constant 0 : index
    %5 = vector.load %arg4[%c0_5, %c0_6, %c0_7] : memref<1x4x256xf32, #tpu.memory_space<vmem>>, vector<1x4x256xf32>
    %6 = vector.shape_cast %5 : vector<1x4x256xf32> to vector<4x256xf32>
    %7 = vector.shape_cast %4 : vector<4x256xf32> to vector<1x4x256xf32>
    tpu.vector_store %arg4[%c0_5, %c0_6, %c0_7], %7 {strides = array<i32>} : memref<1x4x256xf32, #tpu.memory_space<vmem>>, vector<1x4x256xf32>,
    return
  }
  func.func @transform_0(%arg0: i32, %arg1: i32) -> (i32, i32, i32) {
    %c0_i32 = arith.constant 0 : i32
    %c0_i32_0 = arith.constant 0 : i32
    %c0_i32_1 = arith.constant 0 : i32
    return %arg0, %c0_i32, %c0_i32_0 : i32, i32, i32
  }
  func.func @transform_1(%arg0: i32, %arg1: i32) -> (i32, i32, i32) {
    %c0_i32 = arith.constant 0 : i32
    %c0_i32_0 = arith.constant 0 : i32
    return %arg0, %c0_i32, %arg1 : i32, i32, i32
  }
  func.func @transform_2(%arg0: i32, %arg1: i32) -> (i32, i32, i32) {
    %c0_i32 = arith.constant 0 : i32
    %c0_i32_0 = arith.constant 0 : i32
    return %arg0, %c0_i32, %arg1 : i32, i32, i32
  }
}

</mosaic_0001>

<bundles_post_ra>
// kernel: tpu_custom_call.1
= control target key start
LH: loop header
LB: loop body
LE: loop exit
PB: predicated region body
PF: predicated region fallthrough
CT: control target
= control target key end

     0   :  { %7 = vsyncpa [#allocation3], 0  ;;  %s847_s0 = inlined_call_operand.hbm [shape: f32[2,4,4], index: 0, kind: input, shape index: {}]   ;;  %s848_s1 = inlined_call_operand.hbm [shape: f32[2,4,256], index: 1, kind: input, shape index: {}]   ;;  %s849_s2 = inlined_call_operand.hbm [shape: f32[2,4,256], index: 2, kind: output, shape index: {}]  }
   0x1   :  { %9 = vsyncpa [#allocation3 + $0x1], 0 }
   0x2   :  { %10 = vsyncpa [#allocation6], 0 }
   0x3   :  { %12 = vsyncpa [#allocation6 + $0x1], 0 }
   0x4   :  { %13 = vsyncpa [#allocation4], 0 }
   0x5   :  { %15 = vsyncpa [#allocation4 + $0x1], 0  ;;  %s683_s9 = smov 0   ;;  %s685_s10 = smov 0  }
   0x6   :  { %s687_s11 = smov 0   ;;  %s689_s12 = smov 0  }
   0x7   :  { %s691_s13 = smov 0   ;;  %s693_s14 = smov 0  }
   0x8 LB: > { %s430_s15 = sadd.s32 4294967295, %s662_s14   ;;  %s431_s16 = sadd.s32 4294967294, %s662_s14   ;;  %s662_s14 = sphi %s693_s14, %s21_s14   ;;  %s658_s13 = sphi %s691_s13, %s861_s13   ;;  %s654_s12 = sphi %s689_s12, %s860_s12   ;;  %s650_s11 = sphi %s687_s11, %s859_s11   ;;  %s646_s10 = sphi %s685_s10, %s858_s10   ;;  %s642_s9 = sphi %s683_s9, %s857_s9  }
   0x9   : > { %s33_s17 = sadd.s32 1, %s658_s13  ;;  %s40_s18 = sadd.s32 1, %s650_s11 }
   0xa   : > { %p35_p0 = scmp.ge.s32.totalorder %s33_s17, 2  ;;  %p47_p1 = scmp.ne.s32.totalorder %s650_s11, %s646_s10 }
   0xb   : > { %p48_p2 = scmp.eq.s32.totalorder %s662_s14, 0  ;;  %p53_p3 = scmp.ne.s32.totalorder %s646_s10, %s642_s9 }
   0xc   : > { %s863_s17 = smov (%p35_p0, %s33_s17), 0  ;;  %p54_p5 = scmp.eq.s32.totalorder %s430_s15, 0 }
   0xd   : > { %p724_p4 = por %p48_p2, %p47_p1  ;;  %s37_s20 = ssub.s32 %s658_s13, %s863_s17 }
   0xe   : > { %p107_p6 = scmp.eq.s32.totalorder %s430_s15, 1  ;;  %p38_p7 = scmp.eq.s32.totalorder %s37_s20, 0 }
   0xf   : > { %p730_p8 = por %p54_p5, %p53_p3  ;;  %p113_p10 = scmp.eq.s32.totalorder %s431_s16, 1 }
  0x10   : > { %p734_p9 = por %p107_p6, %p47_p1  ;;  %p470_p13 = scmp.lt.s32.totalorder %s662_s14, 2 }
  0x11   : > { %s739_s23 = scalar_select %p38_p7, %s650_s11, %s40_s18  }
  0x12   : > { %p741_p11 = por %p113_p10, %p53_p3  ;;  %s748_s25 = sand.u32 1, %s650_s11  }
  0x13   : > { %s434_s26 = sshll.u32 %s748_s25, 2  ;;  %s435_s27 = sshll.u32 %s658_s13, 6 }
  0x14   : > { %s142_s30 = scalar_lea.hbm %s847_s0, %s435_s27  ;;  %s137_s3 = scalar_lea.vmem [#allocation2], %s434_s26 }
  0x15   : > { %s144_s4 = sshll.u32 %s137_s3, 4  ;;  %p757_p0 = pnand %p470_p13, %p724_p4  ;;  %s145_s4 = int_to_ptr.vmem [resolvable:$true] %s144_s4 }
  0x16   : > { %p439_p1 = scmp.ge.s32.totalorder %s662_s14, 1  ;;  %p170_p2 = scmp.lt.s32.totalorder %s662_s14, 3 }
  0x17   : > { %s134_s6 = scalar_lea.sflag [#allocation3], %s748_s25  ;;  %p524_p3 = pneg %p757_p0 }
  0x18   : > { %s535_s7 = scalar_lea.vmem %s145_s4, 64  ;;  %s664_s8 = smov [#allocation2]  }
  0x19   : > { %p536_p5 = scmp.ne.s32.totalorder %s145_s4, %s535_s7  ;;  %s540_s15 = sshll.u32 %s664_s8, 4  ;;  %s541_s15 = int_to_ptr.vmem [resolvable:$false] %s540_s15 }
  0x1a   : > { %s542_s16 = scalar_lea.vmem %s541_s15, 128  ;;  %p543_p4 = scmp.lt.s32.totalorder %s145_s4, %s541_s15 }
  0x1b   : > { %p538_p6 = pnand %p536_p5, %p524_p3  ;;  %p544_p10 = scmp.lt.s32.totalorder %s542_s16, %s535_s7 }
  0x1d   : > { %p539_p7 = pneg %p538_p6  ;;  %p545_p13 = por %p544_p10, %p543_p4 }
  0x1f   : > { %p546_p12 = pnand %p545_p13, %p539_p7 }
  0x21   : > { %549 = shalt.err (!%p546_p12)
}
  0x22   : > { %462 = dma.hbm_to_vmem [thread:$0]  (!%p757_p0), %s142_s30, 64, %s145_s4, %s134_s6  }
  0x23   : > { %p775_p5 = pnand %p439_p1, %p170_p2  ;;  %s436_s19 = sshll.u32 %s748_s25, 3 }
  0x24   : > { %s451_s20 = sshll.u32 %s658_s13, 7  ;;  %s155_s29 = scalar_lea.vmem [#allocation5], %s436_s19 }
  0x25   : > { %s163_s28 = scalar_lea.hbm %s848_s1, %s451_s20  ;;  %s165_s3 = sshll.u32 %s155_s29, 4  ;;  %s166_s3 = int_to_ptr.vmem [resolvable:$true] %s165_s3 }
  0x26   : > { %s152_s7 = scalar_lea.sflag [#allocation6], %s748_s25  ;;  %s563_s8 = scalar_lea.vmem %s166_s3, 128 }
  0x27   : > { %p564_p12 = scmp.ne.s32.totalorder %s166_s3, %s563_s8  ;;  %s665_s30 = smov [#allocation5]  }
  0x28   : > { %s568_s4 = sshll.u32 %s665_s30, 4  ;;  %s569_s4 = int_to_ptr.vmem [resolvable:$false] %s568_s4 }
  0x29   : > { %p566_p6 = pnand %p564_p12, %p524_p3  ;;  %s570_s6 = scalar_lea.vmem %s569_s4, 256 }
  0x2a   : > { %p571_p1 = scmp.lt.s32.totalorder %s166_s3, %s569_s4  ;;  %p572_p2 = scmp.lt.s32.totalorder %s570_s6, %s563_s8 }
  0x2b   : > { %p567_p7 = pneg %p566_p6 }
  0x2c   : > { %p573_p4 = por %p572_p2, %p571_p1 }
  0x2e   : > { %p574_p10 = pnand %p573_p4, %p567_p7 }
  0x30   : > { %577 = shalt.err (!%p574_p10)
}
  0x31   : > { %465 = dma.hbm_to_vmem [thread:$0]  (!%p757_p0), %s163_s28, 128, %s166_s3, %s152_s7  }
  0x32   : > { %174 = sbr.rel (%p775_p5) target bundleno = 274 (0x112), region = 28  ;;  %s793_s25 = sand.u32 (!%p775_p5), 1, %s646_s10  }
  0x33   : > { %s440_s15 = sshll.u32 (!%p775_p5), %s793_s25, 2  ;;  %s177_s16 = scalar_lea.sflag (!%p775_p5), [#allocation3], %s793_s25 }
  0x34   : > { %s180_s19 = scalar_lea.vmem (!%p775_p5), [#allocation2], %s440_s15 }
  0x37   : > { %629 = dma.done.wait (%p730_p8), %s177_s16, 64  }
  0x38   : > { %631 = vsyncadd (%p730_p8), %s177_s16, 4294967232  ;;  %s441_s5 = sshll.u32 %s793_s25, 3  ;;  %s186_s18 = scalar_lea.sflag [#allocation6], %s793_s25 }
  0x39   : > { %s189_s20 = scalar_lea.vmem [#allocation5], %s441_s5 }
  0x3a   : > { %633 = dma.done.wait (%p730_p8), %s186_s18, 128  }
  0x3b   : > { %635 = vsyncadd (%p730_p8), %s186_s18, 4294967168  ;;  %v666_v0 = vmov 0.0   ;;  %v218_v1 = vld [vmem:[%s189_s20] sm:$0xff]  ;;  %vm225_vm0 = vcmask 1043456   ;;  %v217_v3 = vld [vmem:[%s180_s19] sm:$0xf] }
  0x3c   : > { %294 = vmatprep.mubr.f32.mxu0 %v666_v0  ;;  %v220_v2 = vcombine.high %v218_v1, %v218_v1  ;;  %vm221_vm1 = vcmask 31744   ;;  %s452_s26 = sshll.u32 %s654_s12, 7  ;;  %s214_s27 = scalar_lea.vmem [#allocation7], %s441_s5 }
  0x3d   : > { %s323_s28 = sshll.u32 %s214_s27, 4  ;;  %s321_s3 = scalar_lea.hbm %s849_s2, %s452_s26  ;;  %s324_s28 = int_to_ptr.vmem [resolvable:$true] %s323_s28 }
  0x3e   : > { %443 = vmatprep.subr.msk.mxu0 %vm225_vm0, %v220_v2  ;;  %s307_s7 = scalar_lea.sflag [#allocation4], %s793_s25  ;;  %s578_s8 = scalar_lea.vmem %s324_s28, 128 }
  0x3f   : > { %444 = vmatpush1.msk.msra.mxu0 %vm225_vm0, %v218_v1  ;;  %p579_p8 = scmp.ne.s32.totalorder %s324_s28, %s578_s8  ;;  %s667_s30 = smov [#allocation7]  }
  0x40   : > { %445 = vmatmul.mubr.msk.f32.vlgmr.msra.gmra.mxu0 %vm221_vm1, %v217_v3  ;;  %s582_s4 = sshll.u32 %s667_s30, 4  ;;  %s583_s4 = int_to_ptr.vmem [resolvable:$false] %s582_s4 }
  0x41   : > { %p580_p0 = pnand %p579_p8, %p734_p9  ;;  %s584_s12 = scalar_lea.vmem %s583_s4, 256 }
  0x42   : > { %p585_p13 = scmp.lt.s32.totalorder %s324_s28, %s583_s4  ;;  %p586_p5 = scmp.lt.s32.totalorder %s584_s12, %s578_s8 }
  0x43   : > { %p581_p3 = pneg %p580_p0 }
  0x44   : > { %p587_p12 = por %p586_p5, %p585_p13 }
  0x46   : > { %p588_p6 = pnand %p587_p12, %p581_p3 }
 0x100   : > { %v296_v4 = vpop.f32.mrf.mxu0 }
 0x102   : > { %v298_v5 = vpop.f32.mrf.mxu0 }
 0x103   : > { %v303_v6 = vcombine.low %v296_v4, %v298_v5 }
 0x105   : > { %305 = vst [vmem:[%s214_s27] sm:$0xff] %v303_v6 }
 0x106   : > { %591 = shalt.err (!%p588_p6)
}
 0x107   : > { %s592_s6 = scalar_lea.hbm %s321_s3, 128  ;;  %s596_s16 = scalar_lea.hbm %s849_s2, 256 }
 0x108   : > { %p593_p7 = scmp.ne.s32.totalorder %s321_s3, %s592_s6  ;;  %p597_p4 = scmp.lt.s32.totalorder %s321_s3, %s849_s2 }
 0x109   : > { %p598_p10 = scmp.lt.s32.totalorder %s596_s16, %s592_s6 }
 0x10a   : > { %p594_p1 = pnand %p593_p7, %p734_p9 }
 0x10b   : > { %p599_p8 = por %p598_p10, %p597_p4 }
 0x10c   : > { %p595_p2 = pneg %p594_p1 }
 0x10e   : > { %p600_p0 = pnand %p599_p8, %p595_p2 }
 0x110   : > { %603 = shalt.err (!%p600_p0)
}
 0x111   : > { %457 = dma.vmem_to_hbm [thread:$0]  (%p734_p9), %s324_s28, 128, %s321_s3, %s307_s7  }
 0x112 PF: > { %s335_s18 = sand.u32 1, %s642_s9   ;;  %p856_p3 = scmp.ge.s32.totalorder %s662_s14, 2 }
 0x113   : > { %s336_s20 = scalar_lea.sflag [#allocation4], %s335_s18 }
 0x114   : > { %p467_p13 = pnand %p856_p3, %p741_p11 }
 0x116   : > { %p468_p5 = pneg %p467_p13 }
 0x118   : > { %637 = dma.done.wait (%p468_p5), %s336_s20, 128  }
 0x119   : > { %639 = vsyncadd (%p468_p5), %s336_s20, 4294967168  ;;  %s21_s14 = sadd.s32 1, %s662_s14   ;;  %s857_s9 = smov %s646_s10 }
 0x11a   : > { %p18_p12 = scmp.ge.s32.totalorder %s21_s14, 4   ;;  %s858_s10 = smov %s650_s11 }
 0x11b   : > { %s859_s11 = smov %s739_s23  ;;  %s860_s12 = smov %s658_s13 }
 0x11c   : > { %s861_s13 = smov %s863_s17  ;;  %20 = sbr.rel (!%p18_p12) target bundleno = 8 (0x8), region = 86 }
 0x121   :  { %341 = vsyncpa [#allocation3], 1 }
 0x122   :  { %343 = vsyncpa [#allocation3 + $0x1], 1 }
 0x123   :  { %344 = vsyncpa [#allocation6], 1 }
 0x124   :  { %346 = vsyncpa [#allocation6 + $0x1], 1 }
 0x125   :  { %347 = vsyncpa [#allocation4], 1 }
 0x126   :  { %349 = vsyncpa [#allocation4 + $0x1], 1 }

</bundles_post_ra>
